<compile_context>
chip_gen: v6e
topology: v6e:2x2x1
jax: 0.10.0
libtpu: 0.0.40
codegen_flags: <defaults>
</compile_context>

<pallas_src>
import functools

import jax
import jax.numpy as jnp
import numpy as np
from jax.experimental import pallas as pl
from jax.experimental.pallas import tpu as pltpu

_LANE = 128
_TARGET_ROWS = 4096          # 4096 * 128 * 4 B = 2 MiB per f32 block
_MAX_CHANNEL_UNROLL = 32     # cap on channels packed per block (kernel unroll)


def _round_up(v, m):
    return (v + m - 1) // m * m


def _largest_divisor_leq(n, limit, multiple_of):
    """Largest d with d | n, d <= limit, d % multiple_of == 0 (None if none)."""
    limit = min(limit, n)
    d = (limit // multiple_of) * multiple_of
    while d >= multiple_of:
        if n % d == 0:
            return d
        d -= multiple_of
    return None


def _sublane_multiple(*dtypes):
    """Sublane granularity needed so packed dtypes tile cleanly (f32:8 bf16:16 i8:32)."""
    m = 8
    for dt in dtypes:
        m = max(m, 32 // jnp.dtype(dt).itemsize)
    return m


def _choose_tiling(C, nb, sub):
    """Pick (tcb, trb, nb_padded) for blocks of shape (tcb, trb, 128).

    Grid = (C // tcb, nb_padded // trb).  tcb always divides C and trb always
    divides nb_padded, so no boundary blocks are ever generated.
    """
    if nb >= _TARGET_ROWS:
        # Rows are plentiful: one channel per block, split rows with a clean divisor.
        limit = _TARGET_ROWS
        if C == 1:  # make sure there are >= 2 row steps for megacore balance
            limit = min(limit, max(sub, (nb // 2 // sub) * sub))
        trb = _largest_divisor_leq(nb, limit, sub)
        if trb is not None and trb >= 128:
            return 1, trb, nb
        # Awkward nb (no decent divisor): rare fallback, pad rows to the target.
        return 1, _TARGET_ROWS, _round_up(nb, _TARGET_ROWS)

    # Rows are scarce: take all rows of a channel per block and pack channels.
    trb = nb
    if C > 1:
        budget = max(1, _TARGET_ROWS // max(nb, 1))
        budget = min(budget, _MAX_CHANNEL_UNROLL, max(1, C // 2))  # >= 2 steps
        tcb = _largest_divisor_leq(C, budget, 1)
        return tcb, trb, nb

    # C == 1 (per-tensor / single channel): split rows into >= 2 steps if possible.
    if nb >= 2 * sub:
        t = _largest_divisor_leq(nb, max(sub, (nb // 2 // sub) * sub), sub)
        if t is not None:
            trb = t
    return 1, trb, nb


def _lsq_quant_kernel(s_ref, x_ref, q_ref, *, thd_neg, thd_pos, tcb):
    # s_ref : SMEM (C,) f32  -- clipped per-channel scales
    # x_ref : VMEM (tcb, trb, 128) tile, native input dtype
    # q_ref : VMEM (tcb, trb, 128) output tile, out_dtype
    c0 = pl.program_id(0) * tcb
    tn = jnp.float32(thd_neg)
    tp = jnp.float32(thd_pos)
    for i in range(tcb):                       # static unroll over packed channels
        s = s_ref[c0 + i]                      # scalar f32 from SMEM
        xq = jnp.round(x_ref[i].astype(jnp.float32) / s)   # true divide (bit-exact)
        q_ref[i] = jnp.clip(xq, tn, tp).astype(q_ref.dtype)


def lsq_quan_param_forward(x, s, *, bit, per_channel, all_positive=False,
                           symmetric=False, out_dtype=None,
                           pallas_min_bytes=256 * 1024):
    """JAX/Pallas equivalent of LsqQuanParam.forward (forward values only).

    x : float array; leading axis is the per-channel axis when per_channel=True.
    s : float array, shape (C,) if per_channel else (1,).
    Returns (q, s_scale) matching the PyTorch module's return shapes.
    """
    if all_positive:
        assert not symmetric, "Positive quantization cannot be symmetric"
        thd_neg, thd_pos = 0, 2 ** bit - 1
    elif symmetric:
        thd_neg, thd_pos = -2 ** (bit - 1) + 1, 2 ** (bit - 1) - 1
    else:
        thd_neg, thd_pos = -2 ** (bit - 1), 2 ** (bit - 1) - 1

    # NOTE: s_grad_scale = 1/sqrt(thd_pos * x.numel()) only rescales gradients
    # (grad_scale forward is identity) and does not affect forward values.

    eps = jnp.float32(1e-5)
    s_f32 = s.astype(jnp.float32)
    s_clip = jnp.where(s_f32 > eps, s_f32, eps)            # clip() forward value

    if out_dtype is None:
        out_dtype = x.dtype                                 # keep module semantics

    if per_channel:
        C = x.shape[0]
        assert s.size == C, "per-channel scale must have x.shape[0] entries"
        s_vec = s_clip.reshape(C)
        s_scale = s_clip.reshape((-1,) + (1,) * max(x.ndim - 1, 0))  # == view(-1,1,1,1) for 4D
    else:
        C = 1
        s_vec = s_clip.reshape(1)
        s_scale = s_clip.reshape(s.shape)

    # --- small-tensor fallback: one fused XLA pass beats kernel launch + plumbing ---
    if x.size * jnp.dtype(x.dtype).itemsize < pallas_min_bytes:
        s_b = s_scale if per_channel else s_clip.reshape(1)
        q = jnp.clip(jnp.round(x.astype(jnp.float32) / s_b),
                     float(thd_neg), float(thd_pos)).astype(out_dtype)
        return q, s_scale

    # --- Pallas path: lane/sublane-dense (C, nb, 128) view, native dtype ---
    x2d = x.reshape(C, -1)                                  # free reshape, no astype
    R = x2d.shape[1]
    nb = -(-R // _LANE)                                     # ceil(R / 128)
    sub = _sublane_multiple(x.dtype, out_dtype)
    tcb, trb, nb_p = _choose_tiling(C, nb, sub)
    Rp = nb_p * _LANE
    if Rp != R:                                             # only pad when actually needed
        x2d = jnp.pad(x2d, ((0, 0), (0, Rp - R)))
    x3 = x2d.reshape(C, nb_p, _LANE)
    grid = (C // tcb, nb_p // trb)

    kernel = functools.partial(_lsq_quant_kernel, thd_neg=float(thd_neg),
                               thd_pos=float(thd_pos), tcb=tcb)

    q3 = pl.pallas_call(
        kernel,
        out_shape=jax.ShapeDtypeStruct((C, nb_p, _LANE), out_dtype),
        grid=grid,
        in_specs=[
            pl.BlockSpec(memory_space=pltpu.MemorySpace.SMEM),        # whole (C,) scale vector
            pl.BlockSpec((tcb, trb, _LANE), lambda c, r: (c, r, 0)),  # x tile
        ],
        out_specs=pl.BlockSpec((tcb, trb, _LANE), lambda c, r: (c, r, 0)),
        compiler_params=pltpu.CompilerParams(
            dimension_semantics=("parallel", "parallel"),
            vmem_limit_bytes=32 * 1024 * 1024,
        ),
    )(s_vec, x3)

    if Rp == R:
        q = q3.reshape(x.shape)                             # free, no slice copy
    else:
        q = q3.reshape(C, Rp)[:, :R].reshape(x.shape)
    return q, s_scale


def _reference_forward(x, s, *, bit, per_channel, all_positive=False, symmetric=False):
    # Pure-JAX reference (true divide, matches torch forward semantics).
    if all_positive:
        thd_neg, thd_pos = 0, 2 ** bit - 1
    elif symmetric:
        thd_neg, thd_pos = -2 ** (bit - 1) + 1, 2 ** (bit - 1) - 1
    else:
        thd_neg, thd_pos = -2 ** (bit - 1), 2 ** (bit - 1) - 1
    eps = 1e-5
    s = s.astype(jnp.float32)
    s_scale = jnp.where(s > eps, s, eps)
    if per_channel:
        s_b = s_scale.reshape((-1,) + (1,) * (x.ndim - 1))
    else:
        s_b = s_scale
    q = jnp.clip(jnp.round(x.astype(jnp.float32) / s_b), thd_neg, thd_pos)
    return q, (s_b if per_channel else s_scale)


if __name__ == "__main__":
    key = jax.random.PRNGKey(0)
    k1, k2, k3, k4 = jax.random.split(key, 4)

    # --- 1) per-channel, f32, skinny C (weight-style NCHW), forced Pallas path ---
    x = jax.random.normal(k1, (2, 4, 16, 16), dtype=jnp.float32)
    s = jnp.ones((2,), jnp.float32) + 0.1 * jax.random.normal(k2, (2,), dtype=jnp.float32)
    q, s_scale = lsq_quan_param_forward(x, s, bit=8, per_channel=True, pallas_min_bytes=0)
    q = jax.block_until_ready(q)
    s_scale = jax.block_until_ready(s_scale)
    q_ref, s_ref = _reference_forward(x, s, bit=8, per_channel=True)
    np.testing.assert_allclose(np.asarray(q, np.float32), np.asarray(q_ref), atol=1e-5, rtol=0)
    np.testing.assert_allclose(np.asarray(s_scale), np.asarray(s_ref), atol=0, rtol=0)
    assert q.shape == x.shape and s_scale.shape == (2, 1, 1, 1)

    # --- 2) per-tensor, f32 (flattened single-channel path, >=2 row steps) ---
    x2 = jax.random.normal(k3, (2, 4, 16, 16), dtype=jnp.float32)
    s2 = jnp.array([0.731], jnp.float32)
    q2, s2_scale = lsq_quan_param_forward(x2, s2, bit=8, per_channel=False, pallas_min_bytes=0)
    q2 = jax.block_until_ready(q2)
    q2_ref, s2_ref = _reference_forward(x2, s2, bit=8, per_channel=False)
    np.testing.assert_allclose(np.asarray(q2, np.float32), np.asarray(q2_ref), atol=1e-5, rtol=0)
    np.testing.assert_allclose(np.asarray(s2_scale), np.asarray(s2_ref), atol=0, rtol=0)
    assert q2.shape == x2.shape and s2_scale.shape == (1,)

    # --- 3) per-channel, bf16 in/out, all_positive thresholds, channel packing (tcb=2) ---
    x3 = (2.0 * jax.random.normal(k4, (4, 8, 16, 16), dtype=jnp.float32)).astype(jnp.bfloat16)
    s3 = jnp.array([0.03125, 0.0625, 0.125, 0.25], jnp.float32)   # exact scales
    q3, s3_scale = lsq_quan_param_forward(x3, s3, bit=8, per_channel=True,
                                          all_positive=True, pallas_min_bytes=0)
    q3 = jax.block_until_ready(q3)
    q3_ref, _ = _reference_forward(x3, s3, bit=8, per_channel=True, all_positive=True)
    assert q3.dtype == jnp.bfloat16 and q3.shape == x3.shape
    np.testing.assert_allclose(np.asarray(q3.astype(jnp.float32)), np.asarray(q3_ref),
                               atol=0, rtol=0)

    # --- 4) small-tensor fallback branch (default threshold -> fused jnp path) ---
    qf, _ = lsq_quan_param_forward(x, s, bit=8, per_channel=True)
    qf = jax.block_until_ready(qf)
    np.testing.assert_allclose(np.asarray(qf, np.float32), np.asarray(q_ref), atol=1e-5, rtol=0)

    print("KERNEL_OK")
</pallas_src>

<mosaic_0001>
module attributes {stable_mosaic.version = 11 : i64} {
  func.func @_lsq_quant_kernel(%arg0: i32, %arg1: i32, %arg2: memref<2xf32, #tpu.memory_space<smem>>, %arg3: memref<1x8x128xf32, #tpu.memory_space<vmem>>, %arg4: memref<1x8x128xf32, #tpu.memory_space<vmem>>) attributes {dimension_semantics = [#tpu.dimension_semantics<parallel>, #tpu.dimension_semantics<parallel>], iteration_bounds = array<i64: 2, 1>, scalar_prefetch = 0 : i64, scratch_operands = 0 : i64, tpu.core_type = #tpu.core_type<tc>, window_params = [{transform_indices = @transform_0, window_bounds = array<i64: 2>}, {transform_indices = @transform_1, window_bounds = array<i64: 1, 8, 128>}, {transform_indices = @transform_2, window_bounds = array<i64: 1, 8, 128>}]} {
    %c1_i32 = arith.constant 1 : i32
    %0 = arith.muli %arg0, %c1_i32 : i32
    %c0_i32 = arith.constant 0 : i32
    %1 = arith.addi %0, %c0_i32 : i32
    %2 = arith.index_cast %1 : i32 to index
    %3 = memref.load %arg2[%2] : memref<2xf32, #tpu.memory_space<smem>>
    %c0 = arith.constant 0 : index
    %c0_0 = arith.constant 0 : index
    %c0_1 = arith.constant 0 : index
    %4 = vector.load %arg3[%c0, %c0_0, %c0_1] : memref<1x8x128xf32, #tpu.memory_space<vmem>>, vector<1x8x128xf32>
    %5 = vector.shape_cast %4 : vector<1x8x128xf32> to vector<8x128xf32>
    %6 = vector.broadcast %3 : f32 to vector<8x128xf32>
    %7 = arith.divf %5, %6 : vector<8x128xf32>
    %8 = math.roundeven %7 : vector<8x128xf32>
    %cst = arith.constant -1.280000e+02 : f32
    %cst_2 = arith.constant 1.270000e+02 : f32
    %9 = vector.broadcast %cst : f32 to vector<8x128xf32>
    %10 = arith.maximumf %9, %8 : vector<8x128xf32>
    %11 = vector.broadcast %cst_2 : f32 to vector<8x128xf32>
    %12 = arith.minimumf %11, %10 : vector<8x128xf32>
    %c0_3 = arith.constant 0 : index
    %c0_4 = arith.constant 0 : index
    %c0_5 = arith.constant 0 : index
    %13 = vector.load %arg4[%c0_3, %c0_4, %c0_5] : memref<1x8x128xf32, #tpu.memory_space<vmem>>, vector<1x8x128xf32>
    %14 = vector.shape_cast %13 : vector<1x8x128xf32> to vector<8x128xf32>
    %15 = vector.shape_cast %12 : vector<8x128xf32> to vector<1x8x128xf32>
    tpu.vector_store %arg4[%c0_3, %c0_4, %c0_5], %15 {strides = array<i32>} : memref<1x8x128xf32, #tpu.memory_space<vmem>>, vector<1x8x128xf32>,
    return
  }
  func.func @transform_0(%arg0: i32, %arg1: i32) -> i32 {
    %c0_i32 = arith.constant 0 : i32
    %c0_i32_0 = arith.constant 0 : i32
    return %c0_i32 : i32
  }
  func.func @transform_1(%arg0: i32, %arg1: i32) -> (i32, i32, i32) {
    %c0_i32 = arith.constant 0 : i32
    %c0_i32_0 = arith.constant 0 : i32
    return %arg0, %arg1, %c0_i32 : i32, i32, i32
  }
  func.func @transform_2(%arg0: i32, %arg1: i32) -> (i32, i32, i32) {
    %c0_i32 = arith.constant 0 : i32
    %c0_i32_0 = arith.constant 0 : i32
    return %arg0, %arg1, %c0_i32 : i32, i32, i32
  }
}

</mosaic_0001>

<bundles_post_ra>
// kernel: tpu_custom_call.1
= control target key start
LH: loop header
LB: loop body
LE: loop exit
PB: predicated region body
PF: predicated region fallthrough
CT: control target
= control target key end

     0   :  { %7 = vsyncpa [#allocation5], 0  ;;  %s705_s0 = inlined_call_operand.hbm [shape: f32[2], index: 0, kind: input, shape index: {}]   ;;  %s706_s1 = inlined_call_operand.hbm [shape: f32[2,8,128], index: 1, kind: input, shape index: {}]   ;;  %s707_s2 = inlined_call_operand.hbm [shape: f32[2,8,128], index: 2, kind: output, shape index: {}]  }
   0x1   :  { %8 = vsyncpa [#allocation3], 0 }
   0x2   :  { %10 = vsyncpa [#allocation3 + $0x1], 0 }
   0x3   :  { %11 = vsyncpa [#allocation4], 0 }
   0x4   :  { %13 = vsyncpa [#allocation4 + $0x1], 0  ;;  %s545_s9 = smov 0   ;;  %s547_s10 = smov 0  }
   0x5   :  { %s549_s11 = smov 0   ;;  %s551_s12 = smov 0  }
   0x6   :  { %s553_s13 = smov 0   ;;  %s555_s14 = smov 0  }
   0x7 LB: > { %s304_s15 = sadd.s32 4294967295, %s525_s14   ;;  %s305_s16 = sadd.s32 4294967294, %s525_s14   ;;  %s525_s14 = sphi %s555_s14, %s19_s14   ;;  %s521_s13 = sphi %s553_s13, %s724_s13   ;;  %s517_s12 = sphi %s551_s12, %s723_s12   ;;  %s513_s11 = sphi %s549_s11, %s722_s11   ;;  %s509_s10 = sphi %s547_s10, %s721_s10   ;;  %s505_s9 = sphi %s545_s9, %s720_s9  }
   0x8   : > { %p74_p0 = scmp.ne.s32.totalorder %s509_s10, %s505_s9  ;;  %p579_p1 = scmp.eq.s32.totalorder %s304_s15, 0 }
   0x9   : > { %p583_p2 = scmp.eq.s32.totalorder %s304_s15, 1  ;;  %p106_p3 = scmp.eq.s32.totalorder %s305_s16, 1 }
   0xa   : > { %p589_p4 = por %p579_p1, %p74_p0  ;;  %p306_p5 = scmp.ge.s32.totalorder %s525_s14, 1 }
   0xb   : > { %p594_p6 = por %p106_p3, %p74_p0  ;;  %p113_p7 = scmp.lt.s32.totalorder %s525_s14, 3 }
   0xc   : > { %s31_s22 = sadd.s32 1, %s521_s13  ;;  %s61_s23 = sadd.s32 1, %s513_s11 }
   0xd   : > { %s712_s20 = scalar_select %p594_p6, 1, 0 }
   0xe   : > { %p599_p8 = pnand %p306_p5, %p113_p7  ;;  %p33_p12 = scmp.ge.s32.totalorder %s31_s22, 2 }
   0xf   : > { %p68_p13 = scmp.ne.s32.totalorder %s513_s11, %s509_s10  ;;  %p69_p0 = scmp.eq.s32.totalorder %s525_s14, 0 }
  0x10   : > { %p335_p10 = pneg %p599_p8  ;;  %s527_s24 = smov [#allocation2]  }
  0x11   : > { %s726_s22 = smov (%p33_p12, %s31_s22), 0  ;;  %p618_p3 = por %p69_p0, %p68_p13 }
  0x12   : > { %p336_p11 = pnand %p335_p10, %p579_p1  ;;  %p624_p5 = por %p583_p2, %p68_p13 }
  0x13   : > { %s56_s29 = ssub.s32 %s521_s13, %s726_s22  ;;  %p348_p7 = scmp.lt.s32.totalorder %s525_s14, 2 }
  0x14   : > { %338 = dma.hbm_to_smem (!%p336_p11), %s705_s0, 16, %s527_s24, [#allocation5]  }
  0x15   : > { %s715_s28 = scalar_select %p624_p5, 1, 0 }
  0x16   : > { %p59_p10 = scmp.eq.s32.totalorder %s56_s29, 0  ;;  %s135_s30 = sand.u32 1, %s513_s11  }
  0x17   : > { %s309_s3 = sshll.u32 %s135_s30, 3  ;;  %s310_s5 = sshll.u32 %s521_s13, 7 }
  0x18   : > { %s633_s4 = scalar_select %p59_p10, %s513_s11, %s61_s23  }
  0x19   : > { %s145_s8 = scalar_lea.hbm %s706_s1, %s310_s5  ;;  %s139_s15 = scalar_lea.vmem [#allocation6], %s309_s3 }
  0x1a   : > { %s147_s16 = sshll.u32 %s139_s15, 4  ;;  %p641_p2 = pnand %p348_p7, %p618_p3  ;;  %s148_s16 = int_to_ptr.vmem [resolvable:$true] %s147_s16 }
  0x1b   : > { %s136_s24 = scalar_lea.sflag [#allocation3], %s135_s30  ;;  %s426_s25 = scalar_lea.vmem %s148_s16, 128 }
  0x1c   : > { %p415_p11 = pneg %p641_p2  ;;  %p427_p12 = scmp.ne.s32.totalorder %s148_s16, %s426_s25 }
  0x1d   : > { %s528_s23 = smov [#allocation6]  }
  0x1e   : > { %p429_p13 = pnand %p427_p12, %p415_p11  ;;  %s431_s26 = sshll.u32 %s528_s23, 4  ;;  %s432_s26 = int_to_ptr.vmem [resolvable:$false] %s431_s26 }
  0x1f   : > { %s433_s29 = scalar_lea.vmem %s432_s26, 256  ;;  %p434_p10 = scmp.lt.s32.totalorder %s148_s16, %s432_s26 }
  0x20   : > { %p430_p0 = pneg %p429_p13  ;;  %p435_p9 = scmp.lt.s32.totalorder %s433_s29, %s426_s25 }
  0x22   : > { %p436_p6 = por %p435_p9, %p434_p10 }
  0x24   : > { %p437_p5 = pnand %p436_p6, %p430_p0 }
  0x26   : > { %440 = shalt.err (!%p437_p5)
}
  0x27   : > { %342 = dma.hbm_to_vmem [thread:$0]  (!%p641_p2), %s145_s8, 128, %s148_s16, %s136_s24  }
  0x28   : > { %156 = sbr.rel (%p599_p8) target bundleno = 101 (0x65), region = 28 }
  0x2d   : > { %492 = dma.done.wait (%p579_p1), [#allocation5], 16  }
  0x2e   : > { %494 = vsyncadd (%p579_p1), [#allocation5], 4294967280  ;;  %s656_s27 = sand.u32 1, %s509_s10  }
  0x2f   : > { %s313_s30 = sshll.u32 %s656_s27, 3  ;;  %s163_s3 = scalar_lea.sflag [#allocation3], %s656_s27 }
  0x30   : > { %s166_s5 = scalar_lea.vmem [#allocation6], %s313_s30 }
  0x31   : > { %496 = dma.done.wait (%p589_p4), %s163_s3, 128  }
  0x32   : > { %498 = vsyncadd (%p589_p4), %s163_s3, 4294967168 }
  0x33   : > { %171 = sfence }
  0x34   : > { %s188_s21 = sld [smem:[#allocation2 + %s517_s12]]  ;;  %v189_v1 = vld [vmem:[%s166_s5] sm:$0xff]  ;;  %s187_s17 = scalar_lea.vmem [#allocation7], %s313_s30 }
  0x35   : > { %s212_s19 = sshll.u32 %s187_s17, 4  ;;  %s316_s6 = sshll.u32 %s517_s12, 7  ;;  %s213_s19 = int_to_ptr.vmem [resolvable:$true] %s212_s19 }
  0x36   : > { %s210_s15 = scalar_lea.hbm %s707_s2, %s316_s6  ;;  %s198_s16 = scalar_lea.sflag [#allocation4], %s656_s27 }
  0x37   : > { %s441_s18 = scalar_lea.vmem %s213_s19, 128  ;;  %p717_p4 = scmp.ne.s32.totalorder %s715_s28, 0 }
  0x38   : > { %p442_p1 = scmp.ne.s32.totalorder %s213_s19, %s441_s18  ;;  %s529_s24 = smov [#allocation7]  }
  0x39   : > { %s445_s25 = sshll.u32 %s529_s24, 4  ;;  %s446_s25 = int_to_ptr.vmem [resolvable:$false] %s445_s25 }
  0x3a   : > { %v190_v0 = vstv %s188_s21  ;;  %p443_p6 = pnand %p442_p1, %p717_p4  ;;  %s447_s23 = scalar_lea.vmem %s446_s25, 256 }
  0x3b   : > { %400 = vrcp.f32 %v190_v0  ;;  %p448_p9 = scmp.lt.s32.totalorder %s213_s19, %s446_s25  ;;  %p449_p3 = scmp.lt.s32.totalorder %s447_s23, %s441_s18 }
  0x3c   : > { %p444_p8 = pneg %p443_p6 }
  0x3d   : > { %p450_p5 = por %p449_p3, %p448_p9 }
  0x3f   : > { %p451_p7 = pnand %p450_p5, %p444_p8 }
  0x48   : > { %v401_v2 = vpop.eup %400 }
  0x49   : > { %v192_v3 = vmul.f32 %v401_v2, %v189_v1 }
  0x4b   : > { %v321_v4 = vcvt.f32.s32 %v192_v3  ;;  %v319_v5 = vand.u32 2147483647, %v192_v3  ;;  %v324_v7 = vand.u32 2147483648, %v192_v3 }
  0x4d   : > { %v322_v6 = vcvt.s32.f32 %v321_v4  ;;  %vm320_vm0 = vcmp.lt.f32.partialorder %v319_v5, 8388608.0 }
  0x4f   : > { %v323_v8 = vand.u32 2147483647, %v322_v6 }
  0x51   : > { %v325_v9 = vor.u32 %v324_v7, %v323_v8 }
  0x53   : > { %v326_v10 = vsel %vm320_vm0, %v325_v9, %v192_v3 }
  0x54   : > { %v194_v11 = vmax.f32 %v326_v10, -128.0 }
  0x56   : > { %v195_v12 = vmin.f32 %v194_v11, 127.0 }
  0x58   : > { %196 = vst [vmem:[%s187_s17] sm:$0xff] %v195_v12 }
  0x59   : > { %454 = shalt.err (!%p451_p7)
}
  0x5a   : > { %s455_s12 = scalar_lea.hbm %s210_s15, 128  ;;  %s459_s27 = scalar_lea.hbm %s707_s2, 256 }
  0x5b   : > { %p456_p2 = scmp.ne.s32.totalorder %s210_s15, %s455_s12  ;;  %p460_p13 = scmp.lt.s32.totalorder %s210_s15, %s707_s2 }
  0x5c   : > { %p461_p0 = scmp.lt.s32.totalorder %s459_s27, %s455_s12 }
  0x5d   : > { %p457_p11 = pnand %p456_p2, %p717_p4 }
  0x5e   : > { %p462_p10 = por %p461_p0, %p460_p13 }
  0x5f   : > { %p458_p12 = pneg %p457_p11 }
  0x61   : > { %p463_p1 = pnand %p462_p10, %p458_p12 }
  0x63   : > { %466 = shalt.err (!%p463_p1)
}
  0x64   : > { %333 = dma.vmem_to_hbm [thread:$0]  (%p717_p4), %s213_s19, 128, %s210_s15, %s198_s16  }
  0x65 PF: > { %s224_s5 = sand.u32 1, %s505_s9   ;;  %p718_p6 = scmp.ne.s32.totalorder %s712_s20, 0 }
  0x66   : > { %p719_p8 = scmp.ge.s32.totalorder %s525_s14, 2  ;;  %s225_s21 = scalar_lea.sflag [#allocation4], %s224_s5 }
  0x68   : > { %p344_p9 = pnand %p719_p8, %p718_p6 }
  0x6a   : > { %p345_p3 = pneg %p344_p9 }
  0x6c   : > { %500 = dma.done.wait (%p345_p3), %s225_s21, 128  }
  0x6d   : > { %502 = vsyncadd (%p345_p3), %s225_s21, 4294967168  ;;  %s19_s14 = sadd.s32 1, %s525_s14   ;;  %s720_s9 = smov %s509_s10 }
  0x6e   : > { %p16_p5 = scmp.ge.s32.totalorder %s19_s14, 4   ;;  %s721_s10 = smov %s513_s11 }
  0x6f   : > { %s722_s11 = smov %s633_s4  ;;  %s723_s12 = smov %s521_s13 }
  0x70   : > { %s724_s13 = smov %s726_s22  ;;  %18 = sbr.rel (!%p16_p5) target bundleno = 7 (0x7), region = 78 }
  0x75   :  { %230 = vsyncpa [#allocation3], 1 }
  0x76   :  { %232 = vsyncpa [#allocation3 + $0x1], 1 }
  0x77   :  { %233 = vsyncpa [#allocation4], 1 }
  0x78   :  { %235 = vsyncpa [#allocation4 + $0x1], 1 }
  0x79   :  { %236 = vsyncpa [#allocation5], 1 }
  0x7a   :  { %238 = vsyncpa [#allocation5 + $0x1], 1 }

</bundles_post_ra>
